<compile_context>
chip_gen: v7x
topology: tpu7x:2x2x1
jax: 0.10.0
libtpu: 0.0.40
codegen_flags: <defaults>
</compile_context>

<pallas_src>
import jax
import jax.numpy as jnp
from jax.experimental import pallas as pl
from jax.experimental.pallas import tpu as pltpu

MAX_BLOCK_ROWS = 2048          # (2048, 512) f32 block = 4 MiB per operand
_LANE_CANDIDATES = (512, 256, 128)


def _mse_kernel(out_ref, tgt_ref, res_ref):
    t = tgt_ref[...]
    o = out_ref[...]
    # masked residual; padded / out-of-bounds rows only feed this elementwise
    # store-masked result, never a reduction, so garbage there is harmless.
    d = jnp.where(t > 0.001, t - o, jnp.zeros_like(t))
    res_ref[...] = d * d                                  # loss ** 2


def mse(output, target):
    """Elementwise masked squared error. output/target: any shape, f32."""
    assert output.shape == target.shape
    assert output.dtype == target.dtype
    orig_shape = output.shape
    total = output.size
    dtype = output.dtype

    # --- lane-dense 2D view, no padding whenever 128 | total ---------------
    lanes = None
    for cand in _LANE_CANDIDATES:
        if total % cand == 0:
            lanes = cand
            break

    out_flat = output.reshape(-1)
    tgt_flat = target.reshape(-1)
    if lanes is None:
        # Last resort (total not divisible by 128): minimal pad (< 512 elems).
        # Padded target entries are 0 -> masked out inside the kernel.
        lanes = _LANE_CANDIDATES[0]
        padded_total = pl.cdiv(total, lanes) * lanes
        pad = padded_total - total
        out_flat = jnp.pad(out_flat, (0, pad))
        tgt_flat = jnp.pad(tgt_flat, (0, pad))
    else:
        padded_total = total

    rows = padded_total // lanes
    out2d = out_flat.reshape(rows, lanes)
    tgt2d = tgt_flat.reshape(rows, lanes)

    # --- block sizing (all static Python at trace time) --------------------
    #  * block rows are a multiple of 8 (sublane tile); the partial edge block
    #    is masked by Pallas -- no slab rounding.
    #  * if there is more than one 8-row block of work, force >= 2 grid steps
    #    so "parallel" can shard across both v7x TensorCores.
    if rows <= 8:
        block_rows = rows                                  # full-extent block
    else:
        half = ((pl.cdiv(rows, 2) + 7) // 8) * 8
        block_rows = min(MAX_BLOCK_ROWS, half)
    grid = (pl.cdiv(rows, block_rows),)

    spec = pl.BlockSpec((block_rows, lanes), lambda i: (i, 0))

    res2d = pl.pallas_call(
        _mse_kernel,
        out_shape=jax.ShapeDtypeStruct((rows, lanes), dtype),
        grid_spec=pltpu.PrefetchScalarGridSpec(
            num_scalar_prefetch=0,
            grid=grid,
            in_specs=[spec, spec],
            out_specs=spec,
        ),
        # Prediction buffer is dead after this op -> write the result in place.
        input_output_aliases={0: 0},
        compiler_params=pltpu.CompilerParams(
            dimension_semantics=("parallel",),    # shard grid across v7x's 2 TCs
            vmem_limit_bytes=32 * 1024 * 1024,    # 3 operands x 2 bufs x 4 MiB = 24 MiB
        ),
        cost_estimate=pl.CostEstimate(
            flops=3 * padded_total,
            transcendentals=0,
            bytes_accessed=12 * padded_total,     # read 2x f32, write 1x f32
        ),
    )(out2d, tgt2d)

    if padded_total != total:
        # Rare path (total % 128 != 0): slice off the padded tail.
        return res2d.reshape(-1)[:total].reshape(orig_shape)
    return res2d.reshape(orig_shape)


def mse_reference(output, target):
    val = (target > 0.001).astype(target.dtype)
    loss = target * val - output * val
    return loss ** 2


if __name__ == "__main__":
    key = jax.random.PRNGKey(0)
    k1, k2 = jax.random.split(key)
    B, C, H, W = 2, 4, 16, 16
    # target: mix of positive depth-like values and zeros (invalid pixels)
    target = jax.random.uniform(k1, (B, C, H, W), jnp.float32, -0.5, 2.0)
    target = jnp.where(target > 0.0, target, 0.0)
    output = jax.random.normal(k2, (B, C, H, W), jnp.float32)

    # reference first (the kernel may alias/donate the prediction buffer)
    ref = mse_reference(output, target)

    res = jax.block_until_ready(mse(output, target))

    assert res.shape == (B, C, H, W)
    assert jnp.allclose(res, ref, atol=1e-6, rtol=1e-6)
    print("KERNEL_OK")
</pallas_src>

<mosaic_0001>
module attributes {stable_mosaic.version = 11 : i64} {
  func.func @_mse_kernel(%arg0: i32, %arg1: memref<4x512xf32, #tpu.memory_space<vmem>>, %arg2: memref<4x512xf32, #tpu.memory_space<vmem>>, %arg3: memref<4x512xf32, #tpu.memory_space<vmem>>) attributes {dimension_semantics = [#tpu.dimension_semantics<parallel>], iteration_bounds = array<i64: 1>, scalar_prefetch = 0 : i64, scratch_operands = 0 : i64, tpu.core_type = #tpu.core_type<tc>, window_params = [{transform_indices = @transform_0, window_bounds = array<i64: 4, 512>}, {transform_indices = @transform_1, window_bounds = array<i64: 4, 512>}, {transform_indices = @transform_2, window_bounds = array<i64: 4, 512>}]} {
    %c0 = arith.constant 0 : index
    %c0_0 = arith.constant 0 : index
    %0 = vector.load %arg2[%c0, %c0_0] : memref<4x512xf32, #tpu.memory_space<vmem>>, vector<4x512xf32>
    %c0_1 = arith.constant 0 : index
    %c0_2 = arith.constant 0 : index
    %1 = vector.load %arg1[%c0_1, %c0_2] : memref<4x512xf32, #tpu.memory_space<vmem>>, vector<4x512xf32>
    %cst = arith.constant 1.000000e-03 : f32
    %2 = vector.broadcast %cst : f32 to vector<4x512xf32>
    %3 = arith.cmpf ogt, %0, %2 : vector<4x512xf32>
    %4 = arith.subf %0, %1 : vector<4x512xf32>
    %cst_3 = arith.constant 0.000000e+00 : f32
    %5 = vector.broadcast %cst_3 : f32 to vector<4x512xf32>
    %6 = arith.select %3, %4, %5 : vector<4x512xi1>, vector<4x512xf32>
    %7 = arith.mulf %6, %6 : vector<4x512xf32>
    %c0_4 = arith.constant 0 : index
    %c0_5 = arith.constant 0 : index
    %8 = vector.load %arg3[%c0_4, %c0_5] : memref<4x512xf32, #tpu.memory_space<vmem>>, vector<4x512xf32>
    tpu.vector_store %arg3[%c0_4, %c0_5], %7 {strides = array<i32>} : memref<4x512xf32, #tpu.memory_space<vmem>>, vector<4x512xf32>,
    return
  }
  func.func @transform_0(%arg0: i32) -> (i32, i32) {
    %c0_i32 = arith.constant 0 : i32
    %c0_i32_0 = arith.constant 0 : i32
    return %arg0, %c0_i32 : i32, i32
  }
  func.func @transform_1(%arg0: i32) -> (i32, i32) {
    %c0_i32 = arith.constant 0 : i32
    %c0_i32_0 = arith.constant 0 : i32
    return %arg0, %c0_i32 : i32, i32
  }
  func.func @transform_2(%arg0: i32) -> (i32, i32) {
    %c0_i32 = arith.constant 0 : i32
    %c0_i32_0 = arith.constant 0 : i32
    return %arg0, %c0_i32 : i32, i32
  }
}

</mosaic_0001>

<bundles_post_ra>
// kernel: tpu_custom_call.1
= control target key start
LH: loop header
LB: loop body
LE: loop exit
PB: predicated region body
PF: predicated region fallthrough
CT: control target
= control target key end

     0   :  { %7 = vsyncpa [#allocation3], 0  ;;  %s150_s0 = inlined_call_operand.hbm [shape: f32[4,512], index: 0, kind: input, shape index: {}, may-alias: {0,2}]   ;;  %s151_s1 = inlined_call_operand.vmem [shape: f32[4,512], index: 1, kind: input, shape index: {}]   ;;  %s152_s2 = inlined_call_operand.hbm [shape: f32[4,512], index: 2, kind: output, shape index: {}, may-alias: {0,2}]  }
   0x1   :  { %8 = vsyncpa [#allocation4], 0  ;;  %s103_s9 = smov [#allocation2]   ;;  %s55_s13 = scalar_lea.hbm %s150_s0, 256 }
   0x2   :  { %s15_s10 = sshll.u32 %s103_s9, 4  ;;  %p56_p0 = scmp.ne.s32.totalorder %s150_s0, %s55_s13  ;;  %s16_s10 = int_to_ptr.vmem [resolvable:$true] %s15_s10 }
   0x3   :  { %p59_p1 = scmp.lt.u32.totalorder %s55_s13, %s150_s0 }
   0x5   :  { %p61_p2 = pnand %p59_p1, %p56_p0 }
   0x7   :  { %64 = shalt.err (!%p61_p2)
}
   0x8   :  { %s65_s18 = scalar_lea.vmem %s16_s10, 256  ;;  %p70_p4 = scmp.lt.s32.totalorder %s16_s10, %s16_s10 }
   0x9   :  { %p66_p3 = scmp.ne.s32.totalorder %s16_s10, %s65_s18  ;;  %p71_p5 = scmp.lt.s32.totalorder %s65_s18, %s65_s18 }
   0xb   :  { %p72_p6 = por %p71_p5, %p70_p4 }
   0xd   :  { %p73_p7 = pnand %p72_p6, %p66_p3 }
   0xf   :  { %76 = shalt.err (!%p73_p7)
}
  0x10   :  { %18 = dma.hbm_to_vmem [thread:$0]  %s150_s0, 256, %s16_s10, [#allocation3]  }
  0x11   :  { %99 = dma.done.wait [#allocation3], 256  }
  0x12   :  { %100 = vsyncadd [#allocation3], 4294967040  ;;  %v24_v0 = vld [vmem:[%s151_s1] sm:$0xff]  ;;  %v25_v2 = vld [vmem:[%s151_s1 + $0x8] sm:$0xff]  ;;  %s104_s25 = smov [#allocation5]  }
  0x13   :  { %v26_v1 = vld [vmem:[#allocation2] sm:$0xff]  ;;  %vm28_vm0 = vcmp.gt.f32.partialorder %v24_v0, 0.001  ;;  %v27_v4 = vld [vmem:[#allocation2 + $0x8] sm:$0xff]  ;;  %vm29_vm1 = vcmp.gt.f32.partialorder %v25_v2, 0.001 }
  0x14   :  { %v30_v3 = vsub.f32 %v24_v0, %v26_v1  ;;  %v31_v5 = vsub.f32 %v25_v2, %v27_v4  ;;  %s44_s26 = sshll.u32 %s104_s25, 4  ;;  %s45_s26 = int_to_ptr.vmem [resolvable:$true] %s44_s26 }
  0x15   :  { %s77_s0 = scalar_lea.vmem %s45_s26, 256  ;;  %p82_p9 = scmp.lt.s32.totalorder %s45_s26, %s45_s26 }
  0x16   :  { %v32_v6 = vsel %vm28_vm0, %v30_v3, 0.0  ;;  %v33_v8 = vsel %vm29_vm1, %v31_v5, 0.0  ;;  %p78_p8 = scmp.ne.s32.totalorder %s45_s26, %s77_s0  ;;  %p83_p10 = scmp.lt.s32.totalorder %s77_s0, %s77_s0 }
  0x17   :  { %v34_v7 = vmul.f32 %v32_v6, %v32_v6  ;;  %v35_v9 = vmul.f32 %v33_v8, %v33_v8 }
  0x18   :  { %p84_p11 = por %p83_p10, %p82_p9 }
  0x19   :  { %36 = vst [vmem:[#allocation5] sm:$0xff] %v34_v7  ;;  %37 = vst [vmem:[#allocation5 + $0x8] sm:$0xff] %v35_v9 }
  0x1a   :  { %p85_p12 = pnand %p84_p11, %p78_p8 }
  0x1c   :  { %88 = shalt.err (!%p85_p12)
}
  0x1d   :  { %s89_s28 = scalar_lea.hbm %s152_s2, 256 }
  0x1e   :  { %p90_p13 = scmp.ne.s32.totalorder %s152_s2, %s89_s28  ;;  %p93_p0 = scmp.lt.u32.totalorder %s89_s28, %s152_s2 }
  0x20   :  { %p95_p1 = pnand %p93_p0, %p90_p13 }
  0x22   :  { %98 = shalt.err (!%p95_p1)
}
  0x23   :  { %47 = dma.vmem_to_hbm [thread:$0]  %s45_s26, 256, %s152_s2, [#allocation4]  }
  0x24   :  { %101 = dma.done.wait [#allocation4], 256  }
  0x25   :  { %102 = vsyncadd [#allocation4], 4294967040 }
  0x26   :  { %51 = vsyncpa [#allocation3], 1 }
  0x27   :  { %52 = vsyncpa [#allocation4], 1 }

</bundles_post_ra>
